<compile_context>
chip_gen: v6e
topology: v6e:2x2x1
jax: 0.10.0
libtpu: 0.0.40
codegen_flags: <defaults>
</compile_context>

<pallas_src>
import functools

import jax
import jax.numpy as jnp
from jax.experimental import pallas as pl
from jax.experimental.pallas import tpu as pltpu


def _round_up(x, m):
    return (x + m - 1) // m * m


def encoder_kernel(x_ref, w1_ref, b1_ref, wh_ref, bh_ref, out_ref, *, latent_dim):
    # x arrives in its HBM dtype (f32); cast to bf16 in VMEM right before the
    # MXU pass so the cast costs no extra HBM traffic.
    x = x_ref[...].astype(w1_ref.dtype)
    h = jnp.dot(x, w1_ref[...], preferred_element_type=jnp.float32)
    h = jnp.maximum(h + b1_ref[...], jnp.float32(0.0))           # [TB, HP] f32
    h = h.astype(wh_ref.dtype)                                    # bf16 for 2nd MXU pass

    # Fused (mu | 0.5*logvar) head: single lane-dense [TB, 128] matmul.
    y = jnp.dot(h, wh_ref[...], preferred_element_type=jnp.float32)
    y = y + bh_ref[...]                                           # [TB, OP] f32

    # cols [0, L)   -> mu (linear)
    # cols [L, 2L)  -> sigma = exp(0.5*logvar)   (0.5 folded into wh/bh on host)
    col = jax.lax.broadcasted_iota(jnp.int32, y.shape, dimension=1)
    out_ref[...] = jnp.where(col < latent_dim, y, jnp.exp(y)).astype(out_ref.dtype)


def _vmem_budget_bytes():
    cap = 64 << 20                      # conservative default (v7x per-TC VMEM)
    try:
        cap = int(pltpu.get_tpu_info().vmem_capacity_bytes)
    except Exception:
        pass
    # ~96 MiB on v5e/v6e (128 MiB VMEM), ~48 MiB on v7x (64 MiB VMEM).
    return int(cap * 0.75)


def _vmem_estimate_bytes(tb, d, hp, op, x_bytes=4):
    x_bufs = 2 * tb * d * x_bytes       # x tile (input dtype), double-buffered
    x_cast = tb * d * 2                 # in-kernel bf16 copy of the tile
    w1 = d * hp * 2                     # bf16, single-buffered (Buffered(1))
    heads = hp * op * 2
    biases = (hp + op) * 4
    out_bufs = 2 * tb * op * 4
    interm = tb * hp * 6 + tb * op * 8  # h (f32 + bf16), y / fused select
    return x_bufs + x_cast + w1 + heads + biases + out_bufs + interm


def _pick_batch_tile(b, d, hp, op, budget_bytes, x_bytes=4):
    tb = min(1024, _round_up(b, 8))
    while tb > 8 and _vmem_estimate_bytes(tb, d, hp, op, x_bytes) > budget_bytes:
        tb -= 8
    return max(tb, 8)


def _encoder_pallas_call(x, w1_p, b1_p, wh, bh, *, tb, latent_dim, vmem_limit,
                         single_buffer_weights):
    B, D = x.shape
    HP = w1_p.shape[1]
    OP = wh.shape[1]
    resident = {"pipeline_mode": pl.Buffered(1)} if single_buffer_weights else {}
    return pl.pallas_call(
        functools.partial(encoder_kernel, latent_dim=latent_dim),
        out_shape=jax.ShapeDtypeStruct((B, OP), jnp.float32),
        grid=(pl.cdiv(B, tb),),
        in_specs=[
            pl.BlockSpec((tb, D), lambda i: (i, 0)),               # x: batch-streamed
            pl.BlockSpec((D, HP), lambda i: (0, 0), **resident),   # W1 (padded, bf16)
            pl.BlockSpec((1, HP), lambda i: (0, 0), **resident),   # b1 (padded, f32)
            pl.BlockSpec((HP, OP), lambda i: (0, 0), **resident),  # fused heads weight
            pl.BlockSpec((1, OP), lambda i: (0, 0), **resident),   # fused heads bias
        ],
        out_specs=pl.BlockSpec((tb, OP), lambda i: (i, 0)),
        compiler_params=pltpu.CompilerParams(
            dimension_semantics=("parallel",),
            vmem_limit_bytes=int(vmem_limit),
        ),
    )(x, w1_p, b1_p, wh, bh)


def encoder_forward(x, w1, b1, wmu, bmu, wlv, blv, *, compute_dtype=jnp.bfloat16):
    """x: [B, input_dim].  Weights in PyTorch layout ([out, in]); biases [out]."""
    B, D = x.shape
    H = w1.shape[0]
    L = wmu.shape[0]

    HP = _round_up(H, 128)          # lane-dense hidden width (pad to 128, no wider)
    OP = _round_up(2 * L, 128)      # lane-dense fused output width (mu | logvar)

    # ---- host-side (one-time) weight prep: transpose, pad, fuse heads, fold 0.5 ----
    w1_p = jnp.zeros((D, HP), compute_dtype).at[:, :H].set(w1.T.astype(compute_dtype))
    b1_p = jnp.zeros((1, HP), jnp.float32).at[0, :H].set(b1.astype(jnp.float32))

    wh = jnp.zeros((HP, OP), compute_dtype)
    wh = wh.at[:H, :L].set(wmu.T.astype(compute_dtype))
    wh = wh.at[:H, L:2 * L].set((0.5 * wlv.T).astype(compute_dtype))
    bh = jnp.zeros((1, OP), jnp.float32)
    bh = bh.at[0, :L].set(bmu.astype(jnp.float32))
    bh = bh.at[0, L:2 * L].set(0.5 * blv.astype(jnp.float32))

    # ---- generation-aware batch tile; no x padding / no standalone x cast ----
    budget = _vmem_budget_bytes()
    TB = _pick_batch_tile(B, D, HP, OP, budget, x_bytes=x.dtype.itemsize)

    try:
        fused = _encoder_pallas_call(x, w1_p, b1_p, wh, bh, tb=TB, latent_dim=L,
                                     vmem_limit=budget, single_buffer_weights=True)
        fused = jax.block_until_ready(fused)
    except Exception:
        # Fallback if this JAX build rejects pipeline_mode=pl.Buffered(1).
        fused = _encoder_pallas_call(x, w1_p, b1_p, wh, bh, tb=TB, latent_dim=L,
                                     vmem_limit=budget, single_buffer_weights=False)

    mu = fused[:B, :L]
    sigma = fused[:B, L:2 * L]
    return mu, sigma


def init_linear_params(key, out_features, in_features):
    """Deterministic init mimicking nn.Linear default (uniform +/- 1/sqrt(fan_in))."""
    kw, kb = jax.random.split(key)
    bound = 1.0 / jnp.sqrt(jnp.float32(in_features))
    w = jax.random.uniform(kw, (out_features, in_features), jnp.float32, -bound, bound)
    b = jax.random.uniform(kb, (out_features,), jnp.float32, -bound, bound)
    return w, b


def reference_forward(x, w1, b1, wmu, bmu, wlv, blv):
    h = jnp.maximum(x @ w1.T + b1, 0.0)
    mu = h @ wmu.T + bmu
    logvar = h @ wlv.T + blv
    return mu, jnp.exp(0.5 * logvar)


if __name__ == "__main__":
    # Small shapes consistent with the module: flattened 16x16x3 image
    # (module uses 128*128*3 = 49152; scaled down for the test).
    batch = 8
    size = 16
    input_dim = size * size * 3      # 768
    hidden_dim = 50
    latent_dim = 10

    key = jax.random.PRNGKey(0)
    kx, k1, k2, k3 = jax.random.split(key, 4)

    x = jax.random.normal(kx, (batch, input_dim), jnp.float32)
    w1, b1 = init_linear_params(k1, hidden_dim, input_dim)
    wmu, bmu = init_linear_params(k2, latent_dim, hidden_dim)
    wlv, blv = init_linear_params(k3, latent_dim, hidden_dim)

    mu, sigma = encoder_forward(x, w1, b1, wmu, bmu, wlv, blv)
    jax.block_until_ready((mu, sigma))

    mu_ref, sigma_ref = reference_forward(x, w1, b1, wmu, bmu, wlv, blv)
    # bf16 MXU inputs -> loosened tolerance vs. the f32 reference.
    assert mu.shape == (batch, latent_dim) and sigma.shape == (batch, latent_dim)
    assert jnp.allclose(mu, mu_ref, atol=3e-2, rtol=3e-2), "mu mismatch"
    assert jnp.allclose(sigma, sigma_ref, atol=3e-2, rtol=3e-2), "sigma mismatch"

    print("KERNEL_OK")
</pallas_src>

<mosaic_0001>
module attributes {stable_mosaic.version = 11 : i64} {
  func.func @encoder_kernel(%arg0: i32, %arg1: memref<8x768xf32, #tpu.memory_space<vmem>>, %arg2: memref<768x128xbf16, #tpu.memory_space<vmem>>, %arg3: memref<1x128xf32, #tpu.memory_space<vmem>>, %arg4: memref<128x128xbf16, #tpu.memory_space<vmem>>, %arg5: memref<1x128xf32, #tpu.memory_space<vmem>>, %arg6: memref<8x128xf32, #tpu.memory_space<vmem>>) attributes {dimension_semantics = [#tpu.dimension_semantics<parallel>], iteration_bounds = array<i64: 1>, scalar_prefetch = 0 : i64, scratch_operands = 0 : i64, tpu.core_type = #tpu.core_type<tc>, window_params = [{transform_indices = @transform_0, window_bounds = array<i64: 8, 768>}, {pipeline_mode = #tpu.pipeline_mode<synchronous>, transform_indices = @transform_1, window_bounds = array<i64: 768, 128>}, {pipeline_mode = #tpu.pipeline_mode<synchronous>, transform_indices = @transform_2, window_bounds = array<i64: 1, 128>}, {pipeline_mode = #tpu.pipeline_mode<synchronous>, transform_indices = @transform_3, window_bounds = array<i64: 128, 128>}, {pipeline_mode = #tpu.pipeline_mode<synchronous>, transform_indices = @transform_4, window_bounds = array<i64: 1, 128>}, {transform_indices = @transform_5, window_bounds = array<i64: 8, 128>}]} {
    %c0 = arith.constant 0 : index
    %c0_0 = arith.constant 0 : index
    %0 = vector.load %arg1[%c0, %c0_0] : memref<8x768xf32, #tpu.memory_space<vmem>>, vector<8x768xf32>
    %1 = arith.truncf %0 : vector<8x768xf32> to vector<8x768xbf16>
    %c0_1 = arith.constant 0 : index
    %c0_2 = arith.constant 0 : index
    %2 = vector.load %arg2[%c0_1, %c0_2] : memref<768x128xbf16, #tpu.memory_space<vmem>>, vector<768x128xbf16>
    %cst = arith.constant dense<0.000000e+00> : vector<8x128xf32>
    %3 = tpu.matmul %1, %2, %cst {dimension_numbers = #tpu.dot_dimension_numbers<[1], [0], [0], [1], [0, 0, 1, 1], [], []>} : vector<8x768xbf16>, vector<768x128xbf16>, vector<8x128xf32> -> vector<8x128xf32>
    %c0_3 = arith.constant 0 : index
    %c0_4 = arith.constant 0 : index
    %4 = vector.load %arg3[%c0_3, %c0_4] : memref<1x128xf32, #tpu.memory_space<vmem>>, vector<1x128xf32>
    %5 = vector.broadcast %4 : vector<1x128xf32> to vector<8x128xf32>
    %6 = arith.addf %3, %5 : vector<8x128xf32>
    %cst_5 = arith.constant 0.000000e+00 : f32
    %7 = vector.broadcast %cst_5 : f32 to vector<8x128xf32>
    %8 = arith.maximumf %6, %7 : vector<8x128xf32>
    %9 = arith.truncf %8 : vector<8x128xf32> to vector<8x128xbf16>
    %c0_6 = arith.constant 0 : index
    %c0_7 = arith.constant 0 : index
    %10 = vector.load %arg4[%c0_6, %c0_7] : memref<128x128xbf16, #tpu.memory_space<vmem>>, vector<128x128xbf16>
    %cst_8 = arith.constant dense<0.000000e+00> : vector<8x128xf32>
    %11 = tpu.matmul %9, %10, %cst_8 {dimension_numbers = #tpu.dot_dimension_numbers<[1], [0], [0], [1], [0, 0, 1, 1], [], []>} : vector<8x128xbf16>, vector<128x128xbf16>, vector<8x128xf32> -> vector<8x128xf32>
    %c0_9 = arith.constant 0 : index
    %c0_10 = arith.constant 0 : index
    %12 = vector.load %arg5[%c0_9, %c0_10] : memref<1x128xf32, #tpu.memory_space<vmem>>, vector<1x128xf32>
    %13 = vector.broadcast %12 : vector<1x128xf32> to vector<8x128xf32>
    %14 = arith.addf %11, %13 : vector<8x128xf32>
    %15 = tpu.iota {dimensions = array<i32: 1>} : vector<8x128xi32>
    %c10_i32 = arith.constant 10 : i32
    %16 = vector.broadcast %c10_i32 : i32 to vector<8x128xi32>
    %17 = arith.cmpi slt, %15, %16 : vector<8x128xi32>
    %18 = math.exp %14 : vector<8x128xf32>
    %19 = arith.select %17, %14, %18 : vector<8x128xi1>, vector<8x128xf32>
    %c0_11 = arith.constant 0 : index
    %c0_12 = arith.constant 0 : index
    %20 = vector.load %arg6[%c0_11, %c0_12] : memref<8x128xf32, #tpu.memory_space<vmem>>, vector<8x128xf32>
    tpu.vector_store %arg6[%c0_11, %c0_12], %19 {strides = array<i32>} : memref<8x128xf32, #tpu.memory_space<vmem>>, vector<8x128xf32>,
    return
  }
  func.func @transform_0(%arg0: i32) -> (i32, i32) {
    %c0_i32 = arith.constant 0 : i32
    %c0_i32_0 = arith.constant 0 : i32
    return %arg0, %c0_i32 : i32, i32
  }
  func.func @transform_1(%arg0: i32) -> (i32, i32) {
    %c0_i32 = arith.constant 0 : i32
    %c0_i32_0 = arith.constant 0 : i32
    %c0_i32_1 = arith.constant 0 : i32
    return %c0_i32, %c0_i32_0 : i32, i32
  }
  func.func @transform_2(%arg0: i32) -> (i32, i32) {
    %c0_i32 = arith.constant 0 : i32
    %c0_i32_0 = arith.constant 0 : i32
    %c0_i32_1 = arith.constant 0 : i32
    return %c0_i32, %c0_i32_0 : i32, i32
  }
  func.func @transform_3(%arg0: i32) -> (i32, i32) {
    %c0_i32 = arith.constant 0 : i32
    %c0_i32_0 = arith.constant 0 : i32
    %c0_i32_1 = arith.constant 0 : i32
    return %c0_i32, %c0_i32_0 : i32, i32
  }
  func.func @transform_4(%arg0: i32) -> (i32, i32) {
    %c0_i32 = arith.constant 0 : i32
    %c0_i32_0 = arith.constant 0 : i32
    %c0_i32_1 = arith.constant 0 : i32
    return %c0_i32, %c0_i32_0 : i32, i32
  }
  func.func @transform_5(%arg0: i32) -> (i32, i32) {
    %c0_i32 = arith.constant 0 : i32
    %c0_i32_0 = arith.constant 0 : i32
    return %arg0, %c0_i32 : i32, i32
  }
}

module attributes {stable_mosaic.version = 11 : i64} {
  func.func @encoder_kernel(%arg0: i32, %arg1: memref<8x768xf32, #tpu.memory_space<vmem>>, %arg2: memref<768x128xbf16, #tpu.memory_space<vmem>>, %arg3: memref<1x128xf32, #tpu.memory_space<vmem>>, %arg4: memref<128x128xbf16, #tpu.memory_space<vmem>>, %arg5: memref<1x128xf32, #tpu.memory_space<vmem>>, %arg6: memref<8x128xf32, #tpu.memory_space<vmem>>) attributes {dimension_semantics = [#tpu.dimension_semantics<parallel>], iteration_bounds = array<i64: 1>, scalar_prefetch = 0 : i64, scratch_operands = 0 : i64, tpu.core_type = #tpu.core_type<tc>, window_params = [{transform_indices = @transform_0, window_bounds = array<i64: 8, 768>}, {pipeline_mode = #tpu.pipeline_mode<synchronous>, transform_indices = @transform_1, window_bounds = array<i64: 768, 128>}, {pipeline_mode = #tpu.pipeline_mode<synchronous>, transform_indices = @transform_2, window_bounds = array<i64: 1, 128>}, {pipeline_mode = #tpu.pipeline_mode<synchronous>, transform_indices = @transform_3, window_bounds = array<i64: 128, 128>}, {pipeline_mode = #tpu.pipeline_mode<synchronous>, transform_indices = @transform_4, window_bounds = array<i64: 1, 128>}, {transform_indices = @transform_5, window_bounds = array<i64: 8, 128>}]} {
    %c0 = arith.constant 0 : index
    %c0_0 = arith.constant 0 : index
    %0 = vector.load %arg1[%c0, %c0_0] : memref<8x768xf32, #tpu.memory_space<vmem>>, vector<8x768xf32>
    %1 = arith.truncf %0 : vector<8x768xf32> to vector<8x768xbf16>
    %c0_1 = arith.constant 0 : index
    %c0_2 = arith.constant 0 : index
    %2 = vector.load %arg2[%c0_1, %c0_2] : memref<768x128xbf16, #tpu.memory_space<vmem>>, vector<768x128xbf16>
    %cst = arith.constant dense<0.000000e+00> : vector<8x128xf32>
    %3 = tpu.matmul %1, %2, %cst {dimension_numbers = #tpu.dot_dimension_numbers<[1], [0], [0], [1], [0, 0, 1, 1], [], []>} : vector<8x768xbf16>, vector<768x128xbf16>, vector<8x128xf32> -> vector<8x128xf32>
    %c0_3 = arith.constant 0 : index
    %c0_4 = arith.constant 0 : index
    %4 = vector.load %arg3[%c0_3, %c0_4] : memref<1x128xf32, #tpu.memory_space<vmem>>, vector<1x128xf32>
    %5 = vector.broadcast %4 : vector<1x128xf32> to vector<8x128xf32>
    %6 = arith.addf %3, %5 : vector<8x128xf32>
    %cst_5 = arith.constant 0.000000e+00 : f32
    %7 = vector.broadcast %cst_5 : f32 to vector<8x128xf32>
    %8 = arith.maximumf %6, %7 : vector<8x128xf32>
    %9 = arith.truncf %8 : vector<8x128xf32> to vector<8x128xbf16>
    %c0_6 = arith.constant 0 : index
    %c0_7 = arith.constant 0 : index
    %10 = vector.load %arg4[%c0_6, %c0_7] : memref<128x128xbf16, #tpu.memory_space<vmem>>, vector<128x128xbf16>
    %cst_8 = arith.constant dense<0.000000e+00> : vector<8x128xf32>
    %11 = tpu.matmul %9, %10, %cst_8 {dimension_numbers = #tpu.dot_dimension_numbers<[1], [0], [0], [1], [0, 0, 1, 1], [], []>} : vector<8x128xbf16>, vector<128x128xbf16>, vector<8x128xf32> -> vector<8x128xf32>
    %c0_9 = arith.constant 0 : index
    %c0_10 = arith.constant 0 : index
    %12 = vector.load %arg5[%c0_9, %c0_10] : memref<1x128xf32, #tpu.memory_space<vmem>>, vector<1x128xf32>
    %13 = vector.broadcast %12 : vector<1x128xf32> to vector<8x128xf32>
    %14 = arith.addf %11, %13 : vector<8x128xf32>
    %15 = tpu.iota {dimensions = array<i32: 1>} : vector<8x128xi32>
    %c10_i32 = arith.constant 10 : i32
    %16 = vector.broadcast %c10_i32 : i32 to vector<8x128xi32>
    %17 = arith.cmpi slt, %15, %16 : vector<8x128xi32>
    %18 = math.exp %14 : vector<8x128xf32>
    %19 = arith.select %17, %14, %18 : vector<8x128xi1>, vector<8x128xf32>
    %c0_11 = arith.constant 0 : index
    %c0_12 = arith.constant 0 : index
    %20 = vector.load %arg6[%c0_11, %c0_12] : memref<8x128xf32, #tpu.memory_space<vmem>>, vector<8x128xf32>
    tpu.vector_store %arg6[%c0_11, %c0_12], %19 {strides = array<i32>} : memref<8x128xf32, #tpu.memory_space<vmem>>, vector<8x128xf32>,
    return
  }
  func.func @transform_0(%arg0: i32) -> (i32, i32) {
    %c0_i32 = arith.constant 0 : i32
    %c0_i32_0 = arith.constant 0 : i32
    return %arg0, %c0_i32 : i32, i32
  }
  func.func @transform_1(%arg0: i32) -> (i32, i32) {
    %c0_i32 = arith.constant 0 : i32
    %c0_i32_0 = arith.constant 0 : i32
    %c0_i32_1 = arith.constant 0 : i32
    return %c0_i32, %c0_i32_0 : i32, i32
  }
  func.func @transform_2(%arg0: i32) -> (i32, i32) {
    %c0_i32 = arith.constant 0 : i32
    %c0_i32_0 = arith.constant 0 : i32
    %c0_i32_1 = arith.constant 0 : i32
    return %c0_i32, %c0_i32_0 : i32, i32
  }
  func.func @transform_3(%arg0: i32) -> (i32, i32) {
    %c0_i32 = arith.constant 0 : i32
    %c0_i32_0 = arith.constant 0 : i32
    %c0_i32_1 = arith.constant 0 : i32
    return %c0_i32, %c0_i32_0 : i32, i32
  }
  func.func @transform_4(%arg0: i32) -> (i32, i32) {
    %c0_i32 = arith.constant 0 : i32
    %c0_i32_0 = arith.constant 0 : i32
    %c0_i32_1 = arith.constant 0 : i32
    return %c0_i32, %c0_i32_0 : i32, i32
  }
  func.func @transform_5(%arg0: i32) -> (i32, i32) {
    %c0_i32 = arith.constant 0 : i32
    %c0_i32_0 = arith.constant 0 : i32
    return %arg0, %c0_i32 : i32, i32
  }
}

</mosaic_0001>

<bundles_post_ra>
// kernel: tpu_custom_call.1
= control target key start
LH: loop header
LB: loop body
LE: loop exit
PB: predicated region body
PF: predicated region fallthrough
CT: control target
= control target key end

     0   :  { %10 = vsyncpa [#allocation3], 0  ;;  %s1081_s0 = inlined_call_operand.hbm [shape: f32[8,768], index: 0, kind: input, shape index: {}]   ;;  %s1082_s1 = inlined_call_operand.hbm [shape: bf16[768,128], index: 1, kind: input, shape index: {}]   ;;  %s1083_s2 = inlined_call_operand.vmem [shape: f32[1,128], index: 2, kind: input, shape index: {}]   ;;  %s1084_s3 = inlined_call_operand.hbm [shape: bf16[128,128], index: 3, kind: input, shape index: {}]   ;;  %s1085_s4 = inlined_call_operand.vmem [shape: f32[1,128], index: 4, kind: input, shape index: {}]   ;;  %s1086_s5 = inlined_call_operand.hbm [shape: f32[8,128], index: 5, kind: output, shape index: {}]  }
   0x1   :  { %11 = vsyncpa [#allocation6], 0 }
   0x2   :  { %12 = vsyncpa [#allocation4], 0  ;;  %s1025_s18 = smov [#allocation5]  }
   0x3   :  { %s28_s19 = sshll.u32 %s1025_s18, 4  ;;  %s29_s19 = int_to_ptr.vmem [resolvable:$true] %s28_s19 }
   0x4   :  { %s947_s20 = scalar_lea.vmem %s29_s19, 6144  ;;  %p952_p1 = scmp.lt.s32.totalorder %s29_s19, %s29_s19 }
   0x5   :  { %p948_p0 = scmp.ne.s32.totalorder %s29_s19, %s947_s20  ;;  %p953_p2 = scmp.lt.s32.totalorder %s947_s20, %s947_s20 }
   0x7   :  { %p954_p3 = por %p953_p2, %p952_p1 }
   0x9   :  { %p955_p4 = pnand %p954_p3, %p948_p0 }
   0xb   :  { %958 = shalt.err (!%p955_p4)
}
   0xc   :  { %s1026_s21 = smov 64   ;;  %s1027_s22 = smov 4  }
   0xd   :  { %34 = dma.hbm_to_vmem [thread:$0]  %s1082_s1, 6144, %s29_s19, [#allocation6], %s1026_s21, %s1026_s21, %s1027_s22  }
   0xe   :  { %s1028_s25 = smov [#allocation2]   ;;  %s1029_s27 = smov [#allocation7]  }
   0xf   :  { %s19_s26 = sshll.u32 %s1028_s25, 4  ;;  %s42_s28 = sshll.u32 %s1029_s27, 4  ;;  %s20_s26 = int_to_ptr.vmem [resolvable:$true] %s19_s26  ;;  %s43_s28 = int_to_ptr.vmem [resolvable:$true] %s42_s28 }
  0x10   :  { %s967_s29 = scalar_lea.vmem %s20_s26, 768  ;;  %p972_p6 = scmp.lt.s32.totalorder %s20_s26, %s20_s26 }
  0x11   :  { %p968_p5 = scmp.ne.s32.totalorder %s20_s26, %s967_s29  ;;  %p973_p7 = scmp.lt.s32.totalorder %s967_s29, %s967_s29 }
  0x13   :  { %p974_p8 = por %p973_p7, %p972_p6 }
  0x15   :  { %p975_p9 = pnand %p974_p8, %p968_p5 }
  0x17   :  { %978 = shalt.err (!%p975_p9)
}
  0x18   :  { %22 = dma.hbm_to_vmem [thread:$0]  %s1081_s0, 768, %s20_s26, [#allocation3]  }
  0x19   :  { %s987_s7 = scalar_lea.vmem %s43_s28, 1024  ;;  %p992_p11 = scmp.lt.s32.totalorder %s43_s28, %s43_s28 }
  0x1a   :  { %p988_p10 = scmp.ne.s32.totalorder %s43_s28, %s987_s7  ;;  %p993_p12 = scmp.lt.s32.totalorder %s987_s7, %s987_s7 }
  0x1c   :  { %p994_p13 = por %p993_p12, %p992_p11 }
  0x1e   :  { %p995_p0 = pnand %p994_p13, %p988_p10 }
  0x20   :  { %998 = shalt.err (!%p995_p0)
}
  0x21   :  { %48 = dma.hbm_to_vmem [thread:$0]  %s1084_s3, 1024, %s43_s28, [#allocation6], %s1026_s21, %s1026_s21, %s1027_s22  }
  0x22   :  { %1019 = dma.done.wait [#allocation3], 768  }
  0x23   :  { %1020 = vsyncadd [#allocation3], 4294966528 }
  0x24   :  { %1021 = dma.done.wait [#allocation6], 7168  }
  0x25   :  { %1022 = vsyncadd [#allocation6], 4294960128  ;;  %v881_v0 = vld [vmem:[#allocation5 + $0x78] sm:$0xff]   ;;  %v885_v4 = vld [vmem:[#allocation5 + $0x70] sm:$0xff]   ;;  %v1030_v61 = vmov 0.0   ;;  %vm1031_vm0 = vmmov 0  }
  0x26   :  { %v882_v1 = vld [vmem:[#allocation5 + $0x38] sm:$0xff]   ;;  %778 = vmatprep.subr.bf16.mxu0 %v881_v0  ;;  %v886_v5 = vld [vmem:[#allocation5 + $0x30] sm:$0xff]   ;;  %v889_v8 = vld [vmem:[#allocation5 + $0x68] sm:$0xff]  }
  0x27   :  { %v883_v2 = vld [vmem:[#allocation5 + $0xf8] sm:$0xff]   ;;  %779 = vmatpush3.bf16.msra.mxu0 %v882_v1  ;;  %v887_v6 = vld [vmem:[#allocation5 + $0xf0] sm:$0xff]   ;;  %v890_v9 = vld [vmem:[#allocation5 + $0x28] sm:$0xff]  }
  0x28   :  { %v884_v3 = vld [vmem:[#allocation5 + $0xb8] sm:$0xff]   ;;  %800 = vmatprep.subr.bf16.mxu1 %v883_v2  ;;  %780 = vmatprep.subr.bf16.mxu0 %v885_v4  ;;  %v888_v7 = vld [vmem:[#allocation5 + $0xb0] sm:$0xff]   ;;  %v891_v10 = vld [vmem:[#allocation5 + $0xe8] sm:$0xff]  }
  0x29   :  { %801 = vmatpush3.bf16.msra.mxu1 %v884_v3  ;;  %v892_v11 = vld [vmem:[#allocation5 + $0xa8] sm:$0xff]   ;;  %v893_v12 = vld [vmem:[#allocation5 + $0x60] sm:$0xff]   ;;  %v897_v16 = vld [vmem:[#allocation5 + $0x58] sm:$0xff]  }
  0x2a   :  { %802 = vmatprep.subr.bf16.mxu1 %v887_v6  ;;  %v894_v13 = vld [vmem:[#allocation5 + $0x20] sm:$0xff]   ;;  %v898_v17 = vld [vmem:[#allocation5 + $0x18] sm:$0xff]   ;;  %v901_v20 = vld [vmem:[#allocation5 + $0x50] sm:$0xff]  }
  0x2b   :  { %781 = vmatpush3.bf16.msra.mxu0 %v886_v5  ;;  %v895_v14 = vld [vmem:[#allocation5 + $0xe0] sm:$0xff]   ;;  %v899_v18 = vld [vmem:[#allocation5 + $0xd8] sm:$0xff]   ;;  %v902_v21 = vld [vmem:[#allocation5 + $0x10] sm:$0xff]  }
  0x2c   :  { %782 = vmatprep.subr.bf16.mxu0 %v889_v8  ;;  %v896_v15 = vld [vmem:[#allocation5 + $0xa0] sm:$0xff]   ;;  %v900_v19 = vld [vmem:[#allocation5 + $0x98] sm:$0xff]   ;;  %v903_v22 = vld [vmem:[#allocation5 + $0xd0] sm:$0xff]  }
  0x2d   :  { %803 = vmatpush3.bf16.msra.mxu1 %v888_v7  ;;  %v904_v23 = vld [vmem:[#allocation5 + $0x90] sm:$0xff]   ;;  %v905_v24 = vld [vmem:[#allocation5 + $0x48] sm:$0xff]   ;;  %v909_v28 = vld [vmem:[#allocation5 + $0x40] sm:$0xff]  }
  0x2e   :  { %804 = vmatprep.subr.bf16.mxu1 %v891_v10  ;;  %v906_v25 = vld [vmem:[#allocation5 + $0x8] sm:$0xff]   ;;  %v910_v29 = vld [vmem:[#allocation5] sm:$0xff]   ;;  %v62_v31 = vld [vmem:[#allocation2 + $0x8] sm:$0xff] }
  0x2f   :  { %783 = vmatpush3.bf16.msra.mxu0 %v890_v9  ;;  %v907_v26 = vld [vmem:[#allocation5 + $0xc8] sm:$0xff]   ;;  %v911_v30 = vld [vmem:[#allocation5 + $0xc0] sm:$0xff]   ;;  %v68_v32 = vpack.c.bf16 %v62_v31, %v62_v31  ;;  %v61_v34 = vld [vmem:[#allocation2] sm:$0xff] }
  0x30   :  { %784 = vmatprep.subr.bf16.mxu0 %v893_v12  ;;  %v908_v27 = vld [vmem:[#allocation5 + $0x88] sm:$0xff]   ;;  %v912_v33 = vld [vmem:[#allocation5 + $0x80] sm:$0xff]   ;;  %v67_v35 = vpack.c.bf16 %v61_v34, %v61_v34  ;;  %v913_v36 = vld [vmem:[#allocation5 + $0x178] sm:$0xff]  }
  0x31   :  { %805 = vmatpush3.bf16.msra.mxu1 %v892_v11  ;;  %v64_v37 = vld [vmem:[#allocation2 + $0x18] sm:$0xff]  ;;  %496 = vmatprep.mubr.bf16.mxu0 %v68_v32  ;;  %v914_v39 = vld [vmem:[#allocation5 + $0x138] sm:$0xff]   ;;  %v63_v40 = vld [vmem:[#allocation2 + $0x10] sm:$0xff] }
  0x32   :  { %806 = vmatprep.subr.bf16.mxu1 %v895_v14  ;;  %v70_v38 = vpack.c.bf16 %v64_v37, %v64_v37  ;;  %v69_v41 = vpack.c.bf16 %v63_v40, %v63_v40  ;;  %v915_v42 = vld [vmem:[#allocation5 + $0x170] sm:$0xff]   ;;  %v917_v44 = vld [vmem:[#allocation5 + $0x168] sm:$0xff]   ;;  %v919_v46 = vld [vmem:[#allocation5 + $0x160] sm:$0xff]  }
  0x33   :  { %785 = vmatpush3.bf16.msra.mxu0 %v894_v13  ;;  %v916_v43 = vld [vmem:[#allocation5 + $0x130] sm:$0xff]   ;;  %v918_v45 = vld [vmem:[#allocation5 + $0x128] sm:$0xff]   ;;  %v920_v47 = vld [vmem:[#allocation5 + $0x120] sm:$0xff]  }
  0x34   :  { %786 = vmatprep.subr.bf16.mxu0 %v897_v16  ;;  %536 = vmatprep.mubr.bf16.mxu1 %v70_v38  ;;  %v921_v48 = vld [vmem:[#allocation5 + $0x158] sm:$0xff]   ;;  %v923_v50 = vld [vmem:[#allocation5 + $0x150] sm:$0xff]   ;;  %v925_v54 = vld [vmem:[#allocation5 + $0x148] sm:$0xff]  }
  0x35   :  { %807 = vmatpush3.bf16.msra.mxu1 %v896_v15  ;;  %v922_v49 = vld [vmem:[#allocation5 + $0x118] sm:$0xff]   ;;  %v924_v52 = vld [vmem:[#allocation5 + $0x110] sm:$0xff]   ;;  %v926_v55 = vld [vmem:[#allocation5 + $0x108] sm:$0xff]  }
  0x36   :  { %808 = vmatprep.subr.bf16.mxu1 %v899_v18  ;;  %v66_v51 = vld [vmem:[#allocation2 + $0x28] sm:$0xff]  ;;  %v927_v56 = vld [vmem:[#allocation5 + $0x140] sm:$0xff]   ;;  %v65_v58 = vld [vmem:[#allocation2 + $0x20] sm:$0xff] }
  0x37   :  { %787 = vmatpush3.bf16.msra.mxu0 %v898_v17  ;;  %v72_v53 = vpack.c.bf16 %v66_v51, %v66_v51  ;;  %v928_v57 = vld [vmem:[#allocation5 + $0x100] sm:$0xff]   ;;  %v71_v59 = vpack.c.bf16 %v65_v58, %v65_v58  ;;  %v929_v60 = vld [vmem:[#allocation7 + $0x38] sm:$0xff]   ;;  %v930_v62 = vld [vmem:[#allocation7 + $0x30] sm:$0xff]  }
  0x38   :  { %788 = vmatprep.subr.bf16.mxu0 %v901_v20  ;;  %v931_v63 = vld [vmem:[#allocation7 + $0x28] sm:$0xff]   ;;  %v932_v0 = vld [vmem:[#allocation7 + $0x20] sm:$0xff]   ;;  %v933_v1 = vld [vmem:[#allocation7 + $0x18] sm:$0xff]  }
  0x39   :  { %809 = vmatpush3.bf16.msra.mxu1 %v900_v19  ;;  %v934_v2 = vld [vmem:[#allocation7 + $0x10] sm:$0xff]   ;;  %v935_v3 = vld [vmem:[#allocation7 + $0x8] sm:$0xff]   ;;  %v936_v4 = vld [vmem:[#allocation7] sm:$0xff]  }
  0x3a   :  { %810 = vmatprep.subr.bf16.mxu1 %v903_v22  ;;  %v720_v14 = vld [vmem:[%s1083_s2] ss:$0 sm:$0xff]  ;;  %s1032_s2 = smov [#allocation8]  }
  0x3b   :  { %789 = vmatpush3.bf16.msra.mxu0 %v902_v21  ;;  %s710_s11 = sshll.u32 %s1032_s2, 4  ;;  %s711_s11 = int_to_ptr.vmem [resolvable:$true] %s710_s11 }
  0x3c   :  { %790 = vmatprep.subr.bf16.mxu0 %v905_v24  ;;  %s999_s12 = scalar_lea.vmem %s711_s11, 128  ;;  %p1004_p2 = scmp.lt.s32.totalorder %s711_s11, %s711_s11 }
  0x3d   :  { %811 = vmatpush3.bf16.msra.mxu1 %v904_v23  ;;  %p1000_p1 = scmp.ne.s32.totalorder %s711_s11, %s999_s12  ;;  %p1005_p3 = scmp.lt.s32.totalorder %s999_s12, %s999_s12 }
  0x3e   :  { %812 = vmatprep.subr.bf16.mxu1 %v907_v26  ;;  %v769_v26 = vld [vmem:[%s1085_s4] ss:$0 sm:$0xff] }
  0x3f   :  { %791 = vmatpush3.bf16.msra.mxu0 %v906_v25  ;;  %p1006_p4 = por %p1005_p3, %p1004_p2 }
  0x40   :  { %792 = vmatprep.subr.bf16.mxu0 %v909_v28 }
  0x41   :  { %813 = vmatpush3.bf16.msra.mxu1 %v908_v27  ;;  %p1007_p5 = pnand %p1006_p4, %p1000_p1 }
  0x42   :  { %814 = vmatprep.subr.bf16.mxu1 %v911_v30 }
  0x43   :  { %793 = vmatpush3.bf16.msra.mxu0 %v910_v29 }
  0x44   :  { %822 = vmatprep.subr.bf16.mxu0 %v913_v36 }
  0x45   :  { %815 = vmatpush3.bf16.msra.mxu1 %v912_v33  ;;  %v697_v33 = vlaneseq }
  0x46   :  { %497 = vmatmul.mubr.bf16.vlgmr.msra.gmra.mxu0 %v67_v35  ;;  %853 = vmatprep.subr.bf16.mxu1 %v1030_v61 }
  0x47   :  { %823 = vmatpush3.bf16.msra.mxu0 %v914_v39  ;;  %576 = vmatprep.mubr.bf16.mxu0 %v72_v53  ;;  %v698_v34 = vand.u32 127, %v697_v33 }
  0x48   :  { %537 = vmatmul.mubr.bf16.vlgmr.msra.gmra.mxu1 %v69_v41  ;;  %824 = vmatprep.subr.bf16.mxu0 %v915_v42 }
  0x49   :  { %854 = vmatpush3.bf16.msra.mxu1 %v929_v60  ;;  %869 = vmatprep.mubr.msk.bf16.mxu1 %vm1031_vm0, %v1030_v61  ;;  %vm699_vm1 = vcmp.lt.s32.totalorder %v698_v34, 10 }
  0x4a   :  { %855 = vmatprep.subr.bf16.mxu1 %v1030_v61 }
  0x4b   :  { %825 = vmatpush3.bf16.msra.mxu0 %v916_v43 }
  0x4c   :  { %826 = vmatprep.subr.bf16.mxu0 %v917_v44 }
  0x4d   :  { %856 = vmatpush3.bf16.msra.mxu1 %v930_v62 }
  0x4e   :  { %857 = vmatprep.subr.bf16.mxu1 %v1030_v61 }
  0x4f   :  { %827 = vmatpush3.bf16.msra.mxu0 %v918_v45 }
  0x50   :  { %828 = vmatprep.subr.bf16.mxu0 %v919_v46 }
  0x51   :  { %858 = vmatpush3.bf16.msra.mxu1 %v931_v63 }
  0x52   :  { %859 = vmatprep.subr.bf16.mxu1 %v1030_v61 }
  0x53   :  { %829 = vmatpush3.bf16.msra.mxu0 %v920_v47 }
  0x54   :  { %830 = vmatprep.subr.bf16.mxu0 %v921_v48 }
  0x55   :  { %860 = vmatpush3.bf16.msra.mxu1 %v932_v0 }
  0x56   :  { %861 = vmatprep.subr.bf16.mxu1 %v1030_v61 }
  0x57   :  { %831 = vmatpush3.bf16.msra.mxu0 %v922_v49 }
  0x58   :  { %832 = vmatprep.subr.bf16.mxu0 %v923_v50 }
  0x59   :  { %862 = vmatpush3.bf16.msra.mxu1 %v933_v1 }
  0x5a   :  { %863 = vmatprep.subr.bf16.mxu1 %v1030_v61 }
  0x5b   :  { %833 = vmatpush3.bf16.msra.mxu0 %v924_v52 }
  0x5c   :  { %834 = vmatprep.subr.bf16.mxu0 %v925_v54 }
  0x5d   :  { %864 = vmatpush3.bf16.msra.mxu1 %v934_v2 }
  0x5e   :  { %865 = vmatprep.subr.bf16.mxu1 %v1030_v61 }
  0x5f   :  { %835 = vmatpush3.bf16.msra.mxu0 %v926_v55 }
  0x60   :  { %836 = vmatprep.subr.bf16.mxu0 %v927_v56 }
  0x61   :  { %866 = vmatpush3.bf16.msra.mxu1 %v935_v3 }
  0x62   :  { %867 = vmatprep.subr.bf16.mxu1 %v1030_v61 }
  0x63   :  { %837 = vmatpush3.bf16.msra.mxu0 %v928_v57 }
  0x65   :  { %868 = vmatpush3.bf16.msra.mxu1 %v936_v4 }
  0x66   :  { %577 = vmatmul.mubr.bf16.vlgmr.msra.gmra.mxu0 %v71_v59 }
 0x106   :  { %v794_v5 = vpop.f32.mrf.mxu0 }
 0x108   :  { %v795_v6 = vpop.f32.mrf.mxu0  ;;  %v816_v7 = vpop.f32.mrf.mxu1 }
 0x109   :  { %v796_v13 = vadd.f32 %v795_v6, %v794_v5 }
 0x10a   :  { %v797_v8 = vpop.f32.mrf.mxu0  ;;  %v817_v9 = vpop.f32.mrf.mxu1 }
 0x10b   :  { %v499_v15 = vadd.f32 %v796_v13, %v720_v14  ;;  %v818_v16 = vadd.f32 %v817_v9, %v816_v7 }
 0x10c   :  { %v798_v10 = vpop.f32.mrf.mxu0  ;;  %v819_v11 = vpop.f32.mrf.mxu1 }
 0x10d   :  { %v539_v19 = vadd.f32 %v818_v16, %v499_v15 }
 0x10e   :  { %v820_v12 = vpop.f32.mrf.mxu1 }
 0x126   :  { %v838_v17 = vpop.f32.mrf.mxu0 }
 0x128   :  { %v839_v18 = vpop.f32.mrf.mxu0 }
 0x129   :  { %v840_v20 = vadd.f32 %v839_v18, %v838_v17 }
 0x12a   :  { %v841_v21 = vpop.f32.mrf.mxu0 }
 0x12b   :  { %v579_v22 = vadd.f32 %v840_v20, %v539_v19 }
 0x12c   :  { %v842_v23 = vpop.f32.mrf.mxu0 }
 0x12d   :  { %v584_v24 = vmax.f32 %v579_v22, 0.0 }
 0x12f   :  { %v585_v25 = vpack.c.bf16 %v584_v24, %v584_v24 }
 0x131   :  { %870 = vmatmul.mubr.bf16.vlgmr.msra.gmra.mxu1 %v585_v25 }
 0x1f1   :  { %v691_v27 = vpop.f32.mrf.mxu1 }
 0x1f2   :  { %v692_v28 = vadd.f32 %v769_v26, %v691_v27 }
 0x1f3   :  { %v871_v29 = vpop.f32.mrf.mxu1 }
 0x1f4   :  { %v700_v30 = vmul.f32 1.442695, %v692_v28 }
 0x1f5   :  { %v694_v31 = vpop.f32.mrf.mxu1 }
 0x1f6   :  { %937 = vpow2.f32 %v700_v30 }
 0x1f7   :  { %v872_v32 = vpop.f32.mrf.mxu1 }
 0x203   :  { %v938_v35 = vpop.eup %937 }
 0x204   :  { %v702_v36 = vsel %vm699_vm1, %v692_v28, %v938_v35 }
 0x205   :  { %703 = vst [vmem:[#allocation8] sm:$0xff] %v702_v36 }
 0x206   :  { %1010 = shalt.err (!%p1007_p5)
}
 0x207   :  { %713 = dma.vmem_to_hbm [thread:$0]  %s711_s11, 128, %s1086_s5, [#allocation4]  }
 0x208   :  { %1023 = dma.done.wait [#allocation4], 128  }
 0x209   :  { %1024 = vsyncadd [#allocation4], 4294967168 }
 0x20a   :  { %717 = vsyncpa [#allocation3], 1 }
 0x20b   :  { %718 = vsyncpa [#allocation6], 1 }
 0x20c   :  { %719 = vsyncpa [#allocation4], 1 }

// kernel: tpu_custom_call.1
= control target key start
LH: loop header
LB: loop body
LE: loop exit
PB: predicated region body
PF: predicated region fallthrough
CT: control target
= control target key end

     0   :  { %10 = vsyncpa [#allocation3], 0  ;;  %s1081_s0 = inlined_call_operand.hbm [shape: f32[8,768], index: 0, kind: input, shape index: {}]   ;;  %s1082_s1 = inlined_call_operand.hbm [shape: bf16[768,128], index: 1, kind: input, shape index: {}]   ;;  %s1083_s2 = inlined_call_operand.vmem [shape: f32[1,128], index: 2, kind: input, shape index: {}]   ;;  %s1084_s3 = inlined_call_operand.hbm [shape: bf16[128,128], index: 3, kind: input, shape index: {}]   ;;  %s1085_s4 = inlined_call_operand.vmem [shape: f32[1,128], index: 4, kind: input, shape index: {}]   ;;  %s1086_s5 = inlined_call_operand.hbm [shape: f32[8,128], index: 5, kind: output, shape index: {}]  }
   0x1   :  { %11 = vsyncpa [#allocation6], 0 }
   0x2   :  { %12 = vsyncpa [#allocation4], 0  ;;  %s1025_s18 = smov [#allocation5]  }
   0x3   :  { %s28_s19 = sshll.u32 %s1025_s18, 4  ;;  %s29_s19 = int_to_ptr.vmem [resolvable:$true] %s28_s19 }
   0x4   :  { %s947_s20 = scalar_lea.vmem %s29_s19, 6144  ;;  %p952_p1 = scmp.lt.s32.totalorder %s29_s19, %s29_s19 }
   0x5   :  { %p948_p0 = scmp.ne.s32.totalorder %s29_s19, %s947_s20  ;;  %p953_p2 = scmp.lt.s32.totalorder %s947_s20, %s947_s20 }
   0x7   :  { %p954_p3 = por %p953_p2, %p952_p1 }
   0x9   :  { %p955_p4 = pnand %p954_p3, %p948_p0 }
   0xb   :  { %958 = shalt.err (!%p955_p4)
}
   0xc   :  { %s1026_s21 = smov 64   ;;  %s1027_s22 = smov 4  }
   0xd   :  { %34 = dma.hbm_to_vmem [thread:$0]  %s1082_s1, 6144, %s29_s19, [#allocation6], %s1026_s21, %s1026_s21, %s1027_s22  }
   0xe   :  { %s1028_s25 = smov [#allocation2]   ;;  %s1029_s27 = smov [#allocation7]  }
   0xf   :  { %s19_s26 = sshll.u32 %s1028_s25, 4  ;;  %s42_s28 = sshll.u32 %s1029_s27, 4  ;;  %s20_s26 = int_to_ptr.vmem [resolvable:$true] %s19_s26  ;;  %s43_s28 = int_to_ptr.vmem [resolvable:$true] %s42_s28 }
  0x10   :  { %s967_s29 = scalar_lea.vmem %s20_s26, 768  ;;  %p972_p6 = scmp.lt.s32.totalorder %s20_s26, %s20_s26 }
  0x11   :  { %p968_p5 = scmp.ne.s32.totalorder %s20_s26, %s967_s29  ;;  %p973_p7 = scmp.lt.s32.totalorder %s967_s29, %s967_s29 }
  0x13   :  { %p974_p8 = por %p973_p7, %p972_p6 }
  0x15   :  { %p975_p9 = pnand %p974_p8, %p968_p5 }
  0x17   :  { %978 = shalt.err (!%p975_p9)
}
  0x18   :  { %22 = dma.hbm_to_vmem [thread:$0]  %s1081_s0, 768, %s20_s26, [#allocation3]  }
  0x19   :  { %s987_s7 = scalar_lea.vmem %s43_s28, 1024  ;;  %p992_p11 = scmp.lt.s32.totalorder %s43_s28, %s43_s28 }
  0x1a   :  { %p988_p10 = scmp.ne.s32.totalorder %s43_s28, %s987_s7  ;;  %p993_p12 = scmp.lt.s32.totalorder %s987_s7, %s987_s7 }
  0x1c   :  { %p994_p13 = por %p993_p12, %p992_p11 }
  0x1e   :  { %p995_p0 = pnand %p994_p13, %p988_p10 }
  0x20   :  { %998 = shalt.err (!%p995_p0)
}
  0x21   :  { %48 = dma.hbm_to_vmem [thread:$0]  %s1084_s3, 1024, %s43_s28, [#allocation6], %s1026_s21, %s1026_s21, %s1027_s22  }
  0x22   :  { %1019 = dma.done.wait [#allocation3], 768  }
  0x23   :  { %1020 = vsyncadd [#allocation3], 4294966528 }
  0x24   :  { %1021 = dma.done.wait [#allocation6], 7168  }
  0x25   :  { %1022 = vsyncadd [#allocation6], 4294960128  ;;  %v881_v0 = vld [vmem:[#allocation5 + $0x78] sm:$0xff]   ;;  %v885_v4 = vld [vmem:[#allocation5 + $0x70] sm:$0xff]   ;;  %v1030_v61 = vmov 0.0   ;;  %vm1031_vm0 = vmmov 0  }
  0x26   :  { %v882_v1 = vld [vmem:[#allocation5 + $0x38] sm:$0xff]   ;;  %778 = vmatprep.subr.bf16.mxu0 %v881_v0  ;;  %v886_v5 = vld [vmem:[#allocation5 + $0x30] sm:$0xff]   ;;  %v889_v8 = vld [vmem:[#allocation5 + $0x68] sm:$0xff]  }
  0x27   :  { %v883_v2 = vld [vmem:[#allocation5 + $0xf8] sm:$0xff]   ;;  %779 = vmatpush3.bf16.msra.mxu0 %v882_v1  ;;  %v887_v6 = vld [vmem:[#allocation5 + $0xf0] sm:$0xff]   ;;  %v890_v9 = vld [vmem:[#allocation5 + $0x28] sm:$0xff]  }
  0x28   :  { %v884_v3 = vld [vmem:[#allocation5 + $0xb8] sm:$0xff]   ;;  %800 = vmatprep.subr.bf16.mxu1 %v883_v2  ;;  %780 = vmatprep.subr.bf16.mxu0 %v885_v4  ;;  %v888_v7 = vld [vmem:[#allocation5 + $0xb0] sm:$0xff]   ;;  %v891_v10 = vld [vmem:[#allocation5 + $0xe8] sm:$0xff]  }
  0x29   :  { %801 = vmatpush3.bf16.msra.mxu1 %v884_v3  ;;  %v892_v11 = vld [vmem:[#allocation5 + $0xa8] sm:$0xff]   ;;  %v893_v12 = vld [vmem:[#allocation5 + $0x60] sm:$0xff]   ;;  %v897_v16 = vld [vmem:[#allocation5 + $0x58] sm:$0xff]  }
  0x2a   :  { %802 = vmatprep.subr.bf16.mxu1 %v887_v6  ;;  %v894_v13 = vld [vmem:[#allocation5 + $0x20] sm:$0xff]   ;;  %v898_v17 = vld [vmem:[#allocation5 + $0x18] sm:$0xff]   ;;  %v901_v20 = vld [vmem:[#allocation5 + $0x50] sm:$0xff]  }
  0x2b   :  { %781 = vmatpush3.bf16.msra.mxu0 %v886_v5  ;;  %v895_v14 = vld [vmem:[#allocation5 + $0xe0] sm:$0xff]   ;;  %v899_v18 = vld [vmem:[#allocation5 + $0xd8] sm:$0xff]   ;;  %v902_v21 = vld [vmem:[#allocation5 + $0x10] sm:$0xff]  }
  0x2c   :  { %782 = vmatprep.subr.bf16.mxu0 %v889_v8  ;;  %v896_v15 = vld [vmem:[#allocation5 + $0xa0] sm:$0xff]   ;;  %v900_v19 = vld [vmem:[#allocation5 + $0x98] sm:$0xff]   ;;  %v903_v22 = vld [vmem:[#allocation5 + $0xd0] sm:$0xff]  }
  0x2d   :  { %803 = vmatpush3.bf16.msra.mxu1 %v888_v7  ;;  %v904_v23 = vld [vmem:[#allocation5 + $0x90] sm:$0xff]   ;;  %v905_v24 = vld [vmem:[#allocation5 + $0x48] sm:$0xff]   ;;  %v909_v28 = vld [vmem:[#allocation5 + $0x40] sm:$0xff]  }
  0x2e   :  { %804 = vmatprep.subr.bf16.mxu1 %v891_v10  ;;  %v906_v25 = vld [vmem:[#allocation5 + $0x8] sm:$0xff]   ;;  %v910_v29 = vld [vmem:[#allocation5] sm:$0xff]   ;;  %v62_v31 = vld [vmem:[#allocation2 + $0x8] sm:$0xff] }
  0x2f   :  { %783 = vmatpush3.bf16.msra.mxu0 %v890_v9  ;;  %v907_v26 = vld [vmem:[#allocation5 + $0xc8] sm:$0xff]   ;;  %v911_v30 = vld [vmem:[#allocation5 + $0xc0] sm:$0xff]   ;;  %v68_v32 = vpack.c.bf16 %v62_v31, %v62_v31  ;;  %v61_v34 = vld [vmem:[#allocation2] sm:$0xff] }
  0x30   :  { %784 = vmatprep.subr.bf16.mxu0 %v893_v12  ;;  %v908_v27 = vld [vmem:[#allocation5 + $0x88] sm:$0xff]   ;;  %v912_v33 = vld [vmem:[#allocation5 + $0x80] sm:$0xff]   ;;  %v67_v35 = vpack.c.bf16 %v61_v34, %v61_v34  ;;  %v913_v36 = vld [vmem:[#allocation5 + $0x178] sm:$0xff]  }
  0x31   :  { %805 = vmatpush3.bf16.msra.mxu1 %v892_v11  ;;  %v64_v37 = vld [vmem:[#allocation2 + $0x18] sm:$0xff]  ;;  %496 = vmatprep.mubr.bf16.mxu0 %v68_v32  ;;  %v914_v39 = vld [vmem:[#allocation5 + $0x138] sm:$0xff]   ;;  %v63_v40 = vld [vmem:[#allocation2 + $0x10] sm:$0xff] }
  0x32   :  { %806 = vmatprep.subr.bf16.mxu1 %v895_v14  ;;  %v70_v38 = vpack.c.bf16 %v64_v37, %v64_v37  ;;  %v69_v41 = vpack.c.bf16 %v63_v40, %v63_v40  ;;  %v915_v42 = vld [vmem:[#allocation5 + $0x170] sm:$0xff]   ;;  %v917_v44 = vld [vmem:[#allocation5 + $0x168] sm:$0xff]   ;;  %v919_v46 = vld [vmem:[#allocation5 + $0x160] sm:$0xff]  }
  0x33   :  { %785 = vmatpush3.bf16.msra.mxu0 %v894_v13  ;;  %v916_v43 = vld [vmem:[#allocation5 + $0x130] sm:$0xff]   ;;  %v918_v45 = vld [vmem:[#allocation5 + $0x128] sm:$0xff]   ;;  %v920_v47 = vld [vmem:[#allocation5 + $0x120] sm:$0xff]  }
  0x34   :  { %786 = vmatprep.subr.bf16.mxu0 %v897_v16  ;;  %536 = vmatprep.mubr.bf16.mxu1 %v70_v38  ;;  %v921_v48 = vld [vmem:[#allocation5 + $0x158] sm:$0xff]   ;;  %v923_v50 = vld [vmem:[#allocation5 + $0x150] sm:$0xff]   ;;  %v925_v54 = vld [vmem:[#allocation5 + $0x148] sm:$0xff]  }
  0x35   :  { %807 = vmatpush3.bf16.msra.mxu1 %v896_v15  ;;  %v922_v49 = vld [vmem:[#allocation5 + $0x118] sm:$0xff]   ;;  %v924_v52 = vld [vmem:[#allocation5 + $0x110] sm:$0xff]   ;;  %v926_v55 = vld [vmem:[#allocation5 + $0x108] sm:$0xff]  }
  0x36   :  { %808 = vmatprep.subr.bf16.mxu1 %v899_v18  ;;  %v66_v51 = vld [vmem:[#allocation2 + $0x28] sm:$0xff]  ;;  %v927_v56 = vld [vmem:[#allocation5 + $0x140] sm:$0xff]   ;;  %v65_v58 = vld [vmem:[#allocation2 + $0x20] sm:$0xff] }
  0x37   :  { %787 = vmatpush3.bf16.msra.mxu0 %v898_v17  ;;  %v72_v53 = vpack.c.bf16 %v66_v51, %v66_v51  ;;  %v928_v57 = vld [vmem:[#allocation5 + $0x100] sm:$0xff]   ;;  %v71_v59 = vpack.c.bf16 %v65_v58, %v65_v58  ;;  %v929_v60 = vld [vmem:[#allocation7 + $0x38] sm:$0xff]   ;;  %v930_v62 = vld [vmem:[#allocation7 + $0x30] sm:$0xff]  }
  0x38   :  { %788 = vmatprep.subr.bf16.mxu0 %v901_v20  ;;  %v931_v63 = vld [vmem:[#allocation7 + $0x28] sm:$0xff]   ;;  %v932_v0 = vld [vmem:[#allocation7 + $0x20] sm:$0xff]   ;;  %v933_v1 = vld [vmem:[#allocation7 + $0x18] sm:$0xff]  }
  0x39   :  { %809 = vmatpush3.bf16.msra.mxu1 %v900_v19  ;;  %v934_v2 = vld [vmem:[#allocation7 + $0x10] sm:$0xff]   ;;  %v935_v3 = vld [vmem:[#allocation7 + $0x8] sm:$0xff]   ;;  %v936_v4 = vld [vmem:[#allocation7] sm:$0xff]  }
  0x3a   :  { %810 = vmatprep.subr.bf16.mxu1 %v903_v22  ;;  %v720_v14 = vld [vmem:[%s1083_s2] ss:$0 sm:$0xff]  ;;  %s1032_s2 = smov [#allocation8]  }
  0x3b   :  { %789 = vmatpush3.bf16.msra.mxu0 %v902_v21  ;;  %s710_s11 = sshll.u32 %s1032_s2, 4  ;;  %s711_s11 = int_to_ptr.vmem [resolvable:$true] %s710_s11 }
  0x3c   :  { %790 = vmatprep.subr.bf16.mxu0 %v905_v24  ;;  %s999_s12 = scalar_lea.vmem %s711_s11, 128  ;;  %p1004_p2 = scmp.lt.s32.totalorder %s711_s11, %s711_s11 }
  0x3d   :  { %811 = vmatpush3.bf16.msra.mxu1 %v904_v23  ;;  %p1000_p1 = scmp.ne.s32.totalorder %s711_s11, %s999_s12  ;;  %p1005_p3 = scmp.lt.s32.totalorder %s999_s12, %s999_s12 }
  0x3e   :  { %812 = vmatprep.subr.bf16.mxu1 %v907_v26  ;;  %v769_v26 = vld [vmem:[%s1085_s4] ss:$0 sm:$0xff] }
  0x3f   :  { %791 = vmatpush3.bf16.msra.mxu0 %v906_v25  ;;  %p1006_p4 = por %p1005_p3, %p1004_p2 }
  0x40   :  { %792 = vmatprep.subr.bf16.mxu0 %v909_v28 }
  0x41   :  { %813 = vmatpush3.bf16.msra.mxu1 %v908_v27  ;;  %p1007_p5 = pnand %p1006_p4, %p1000_p1 }
  0x42   :  { %814 = vmatprep.subr.bf16.mxu1 %v911_v30 }
  0x43   :  { %793 = vmatpush3.bf16.msra.mxu0 %v910_v29 }
  0x44   :  { %822 = vmatprep.subr.bf16.mxu0 %v913_v36 }
  0x45   :  { %815 = vmatpush3.bf16.msra.mxu1 %v912_v33  ;;  %v697_v33 = vlaneseq }
  0x46   :  { %497 = vmatmul.mubr.bf16.vlgmr.msra.gmra.mxu0 %v67_v35  ;;  %853 = vmatprep.subr.bf16.mxu1 %v1030_v61 }
  0x47   :  { %823 = vmatpush3.bf16.msra.mxu0 %v914_v39  ;;  %576 = vmatprep.mubr.bf16.mxu0 %v72_v53  ;;  %v698_v34 = vand.u32 127, %v697_v33 }
  0x48   :  { %537 = vmatmul.mubr.bf16.vlgmr.msra.gmra.mxu1 %v69_v41  ;;  %824 = vmatprep.subr.bf16.mxu0 %v915_v42 }
  0x49   :  { %854 = vmatpush3.bf16.msra.mxu1 %v929_v60  ;;  %869 = vmatprep.mubr.msk.bf16.mxu1 %vm1031_vm0, %v1030_v61  ;;  %vm699_vm1 = vcmp.lt.s32.totalorder %v698_v34, 10 }
  0x4a   :  { %855 = vmatprep.subr.bf16.mxu1 %v1030_v61 }
  0x4b   :  { %825 = vmatpush3.bf16.msra.mxu0 %v916_v43 }
  0x4c   :  { %826 = vmatprep.subr.bf16.mxu0 %v917_v44 }
  0x4d   :  { %856 = vmatpush3.bf16.msra.mxu1 %v930_v62 }
  0x4e   :  { %857 = vmatprep.subr.bf16.mxu1 %v1030_v61 }
  0x4f   :  { %827 = vmatpush3.bf16.msra.mxu0 %v918_v45 }
  0x50   :  { %828 = vmatprep.subr.bf16.mxu0 %v919_v46 }
  0x51   :  { %858 = vmatpush3.bf16.msra.mxu1 %v931_v63 }
  0x52   :  { %859 = vmatprep.subr.bf16.mxu1 %v1030_v61 }
  0x53   :  { %829 = vmatpush3.bf16.msra.mxu0 %v920_v47 }
  0x54   :  { %830 = vmatprep.subr.bf16.mxu0 %v921_v48 }
  0x55   :  { %860 = vmatpush3.bf16.msra.mxu1 %v932_v0 }
  0x56   :  { %861 = vmatprep.subr.bf16.mxu1 %v1030_v61 }
  0x57   :  { %831 = vmatpush3.bf16.msra.mxu0 %v922_v49 }
  0x58   :  { %832 = vmatprep.subr.bf16.mxu0 %v923_v50 }
  0x59   :  { %862 = vmatpush3.bf16.msra.mxu1 %v933_v1 }
  0x5a   :  { %863 = vmatprep.subr.bf16.mxu1 %v1030_v61 }
  0x5b   :  { %833 = vmatpush3.bf16.msra.mxu0 %v924_v52 }
  0x5c   :  { %834 = vmatprep.subr.bf16.mxu0 %v925_v54 }
  0x5d   :  { %864 = vmatpush3.bf16.msra.mxu1 %v934_v2 }
  0x5e   :  { %865 = vmatprep.subr.bf16.mxu1 %v1030_v61 }
  0x5f   :  { %835 = vmatpush3.bf16.msra.mxu0 %v926_v55 }
  0x60   :  { %836 = vmatprep.subr.bf16.mxu0 %v927_v56 }
  0x61   :  { %866 = vmatpush3.bf16.msra.mxu1 %v935_v3 }
  0x62   :  { %867 = vmatprep.subr.bf16.mxu1 %v1030_v61 }
  0x63   :  { %837 = vmatpush3.bf16.msra.mxu0 %v928_v57 }
  0x65   :  { %868 = vmatpush3.bf16.msra.mxu1 %v936_v4 }
  0x66   :  { %577 = vmatmul.mubr.bf16.vlgmr.msra.gmra.mxu0 %v71_v59 }
 0x106   :  { %v794_v5 = vpop.f32.mrf.mxu0 }
 0x108   :  { %v795_v6 = vpop.f32.mrf.mxu0  ;;  %v816_v7 = vpop.f32.mrf.mxu1 }
 0x109   :  { %v796_v13 = vadd.f32 %v795_v6, %v794_v5 }
 0x10a   :  { %v797_v8 = vpop.f32.mrf.mxu0  ;;  %v817_v9 = vpop.f32.mrf.mxu1 }
 0x10b   :  { %v499_v15 = vadd.f32 %v796_v13, %v720_v14  ;;  %v818_v16 = vadd.f32 %v817_v9, %v816_v7 }
 0x10c   :  { %v798_v10 = vpop.f32.mrf.mxu0  ;;  %v819_v11 = vpop.f32.mrf.mxu1 }
 0x10d   :  { %v539_v19 = vadd.f32 %v818_v16, %v499_v15 }
 0x10e   :  { %v820_v12 = vpop.f32.mrf.mxu1 }
 0x126   :  { %v838_v17 = vpop.f32.mrf.mxu0 }
 0x128   :  { %v839_v18 = vpop.f32.mrf.mxu0 }
 0x129   :  { %v840_v20 = vadd.f32 %v839_v18, %v838_v17 }
 0x12a   :  { %v841_v21 = vpop.f32.mrf.mxu0 }
 0x12b   :  { %v579_v22 = vadd.f32 %v840_v20, %v539_v19 }
 0x12c   :  { %v842_v23 = vpop.f32.mrf.mxu0 }
 0x12d   :  { %v584_v24 = vmax.f32 %v579_v22, 0.0 }
 0x12f   :  { %v585_v25 = vpack.c.bf16 %v584_v24, %v584_v24 }
 0x131   :  { %870 = vmatmul.mubr.bf16.vlgmr.msra.gmra.mxu1 %v585_v25 }
 0x1f1   :  { %v691_v27 = vpop.f32.mrf.mxu1 }
 0x1f2   :  { %v692_v28 = vadd.f32 %v769_v26, %v691_v27 }
 0x1f3   :  { %v871_v29 = vpop.f32.mrf.mxu1 }
 0x1f4   :  { %v700_v30 = vmul.f32 1.442695, %v692_v28 }
 0x1f5   :  { %v694_v31 = vpop.f32.mrf.mxu1 }
 0x1f6   :  { %937 = vpow2.f32 %v700_v30 }
 0x1f7   :  { %v872_v32 = vpop.f32.mrf.mxu1 }
 0x203   :  { %v938_v35 = vpop.eup %937 }
 0x204   :  { %v702_v36 = vsel %vm699_vm1, %v692_v28, %v938_v35 }
 0x205   :  { %703 = vst [vmem:[#allocation8] sm:$0xff] %v702_v36 }
 0x206   :  { %1010 = shalt.err (!%p1007_p5)
}
 0x207   :  { %713 = dma.vmem_to_hbm [thread:$0]  %s711_s11, 128, %s1086_s5, [#allocation4]  }
 0x208   :  { %1023 = dma.done.wait [#allocation4], 128  }
 0x209   :  { %1024 = vsyncadd [#allocation4], 4294967168 }
 0x20a   :  { %717 = vsyncpa [#allocation3], 1 }
 0x20b   :  { %718 = vsyncpa [#allocation6], 1 }
 0x20c   :  { %719 = vsyncpa [#allocation4], 1 }

</bundles_post_ra>
